<compile_context>
chip_gen: v7x
topology: tpu7x:2x2x1
jax: 0.10.0
libtpu: 0.0.40
codegen_flags: <defaults>
</compile_context>

<pallas_src>
import numpy as np
import jax
import jax.numpy as jnp
from jax import lax
from jax.experimental import pallas as pl
from jax.experimental.pallas import tpu as pltpu


def context_encoder_kernel(x_ref, w1_ref, b1_ref, w2_ref, b2_ref, w3_ref, b3_ref, out_ref):
    TB, L, Cin = x_ref.shape
    n = TB * L
    x = x_ref[...].reshape(n, Cin)                       # (TB*L, Cin) f32

    # 'same'-padding validity masks at per-sample boundaries. Hoisted: built once per
    # grid step, shared by all three conv layers, broadcast over the channel (lane) axis.
    pos = lax.broadcasted_iota(jnp.int32, (n, 1), 0) % L
    left_ok = pos >= 1            # row l has a valid l-1 neighbour inside its own sample
    right_ok = pos <= L - 2       # row l has a valid l+1 neighbour inside its own sample

    def conv1d_same_k3_relu(h, w, b):
        # h: (n, Cin) f32, w: (3, Cin, Cout) bf16, b: (1, Cout) f32
        hb = h.astype(jnp.bfloat16)                                 # bf16 MXU operands
        a = jnp.dot(hb, w[0], preferred_element_type=jnp.float32)   # tap for x[l-1]
        c = jnp.dot(hb, w[1], preferred_element_type=jnp.float32)   # center tap
        d = jnp.dot(hb, w[2], preferred_element_type=jnp.float32)   # tap for x[l+1]
        a_sh = jnp.where(left_ok, jnp.roll(a, 1, axis=0), 0.0)      # out[l] += a[l-1]
        d_sh = jnp.where(right_ok, jnp.roll(d, -1, axis=0), 0.0)    # out[l] += d[l+1]
        return jnp.maximum(a_sh + c + d_sh + b, 0.0)                # elementwise in f32

    y1 = conv1d_same_k3_relu(x, w1_ref[...], b1_ref[...])     # (n, 64)
    y2 = conv1d_same_k3_relu(y1, w2_ref[...], b2_ref[...])    # (n, 32)
    y3 = conv1d_same_k3_relu(y2, w3_ref[...], b3_ref[...])    # (n, 32)

    # Per-sample global max-pool over the length axis (segmented: no cross-sample bleed).
    m1 = jnp.max(y1.reshape(TB, L, -1), axis=1)   # (TB, 64)
    m2 = jnp.max(y2.reshape(TB, L, -1), axis=1)   # (TB, 32)
    m3 = jnp.max(y3.reshape(TB, L, -1), axis=1)   # (TB, 32)

    # Dense, lane-aligned (TB, 128) output slab.
    out_ref[...] = jnp.concatenate([m1, m2, m3], axis=1).astype(out_ref.dtype)


def _pick_tile_b(B, L):
    """Batch tile so each grid step feeds the MXU >=128 rows, bounded for VMEM."""
    target = max(1, pl.cdiv(128, L))                     # rows goal: TB*L >= 128
    tb = min(B, max(8, target))
    tb = max(1, min(tb, max(1, 2048 // max(L, 1))))      # cap live activation rows per step
    if tb < B:
        tb = ((tb + 7) // 8) * 8                         # sublane-aligned block when splitting B
    return tb


def context_encoder(x, params, *, tile_b=None):
    """x: (B, L, input_dim) f32; params: list of (w (3,Cin,Cout) f32, b (1,Cout) f32)."""
    B, L, Cin = x.shape
    (w1, b1), (w2, b2), (w3, b3) = params
    out_dim = w1.shape[2] + w2.shape[2] + w3.shape[2]

    if tile_b is None:
        tile_b = _pick_tile_b(B, L)
    tile_b = int(tile_b)

    b_pad = pl.cdiv(B, tile_b) * tile_b
    if b_pad != B:
        # Zero-pad ragged batch; padded rows are sliced off after the call.
        x = jnp.pad(x, ((0, b_pad - B), (0, 0), (0, 0)))
    grid = (b_pad // tile_b,)

    # Pre-cast weights to bf16 in the wrapper (MXU-native on v6e/v7x); biases stay f32.
    w1, w2, w3 = (w.astype(jnp.bfloat16) for w in (w1, w2, w3))

    def rep_spec(shape):
        nd = len(shape)
        return pl.BlockSpec(shape, lambda i, _nd=nd: (0,) * _nd)

    out = pl.pallas_call(
        context_encoder_kernel,
        out_shape=jax.ShapeDtypeStruct((b_pad, out_dim), jnp.float32),
        grid_spec=pltpu.PrefetchScalarGridSpec(
            num_scalar_prefetch=0,
            grid=grid,
            in_specs=[
                pl.BlockSpec((tile_b, L, Cin), lambda i: (i, 0, 0)),
                rep_spec(w1.shape), rep_spec(b1.shape),
                rep_spec(w2.shape), rep_spec(b2.shape),
                rep_spec(w3.shape), rep_spec(b3.shape),
            ],
            out_specs=pl.BlockSpec((tile_b, out_dim), lambda i: (i, 0)),
        ),
        compiler_params=pltpu.CompilerParams(
            dimension_semantics=("parallel",),       # megacore-shardable batch axis (v7x)
            vmem_limit_bytes=32 * 1024 * 1024,       # explicit budget (fits v5e/v6e/v7x)
        ),
    )(x, w1, b1, w2, b2, w3, b3)
    return out[:B]


def ref_forward(x, params):
    """Pure-JAX f32 reference mirroring the PyTorch module (NCL conv path)."""
    h = jnp.transpose(x, (0, 2, 1))  # (B, C, L)
    feats = []
    for w, b in params:
        wt = jnp.transpose(w, (2, 1, 0))  # (Cout, Cin, K) == PyTorch Conv1d weight layout
        h = lax.conv_general_dilated(h, wt, window_strides=(1,), padding='SAME',
                                     dimension_numbers=('NCW', 'OIW', 'NCW'))
        h = jax.nn.relu(h + b[:, :, None])
        feats.append(jnp.max(h, axis=2))  # global max-pool over length
    return jnp.concatenate(feats, axis=1)


if __name__ == "__main__":
    key = jax.random.PRNGKey(0)
    B, L, input_dim = 2, 8, 4          # batch, context_num, input_dim
    K = 3
    channels = [(input_dim, 64), (64, 32), (32, 32)]
    out_dim = sum(co for _, co in channels)

    params = []
    for i, (ci, co) in enumerate(channels):
        kw, kb = jax.random.split(jax.random.fold_in(key, i))
        w = jax.random.normal(kw, (K, ci, co), jnp.float32) * (1.0 / np.sqrt(ci * K))
        b = jax.random.normal(kb, (1, co), jnp.float32) * 0.1
        params.append((w, b))

    # Small case (single grid step, TB == B).
    x = jax.random.normal(jax.random.fold_in(key, 100), (B, L, input_dim), jnp.float32)
    out = jax.block_until_ready(context_encoder(x, params))
    ref = ref_forward(x, params)
    assert out.shape == (B, out_dim)
    np.testing.assert_allclose(np.asarray(out), np.asarray(ref), rtol=3e-2, atol=3e-2)

    # Larger case exercising batch tiling, ragged padding, and a multi-step parallel grid.
    B2 = 20
    x2 = jax.random.normal(jax.random.fold_in(key, 200), (B2, L, input_dim), jnp.float32)
    out2 = jax.block_until_ready(context_encoder(x2, params))
    ref2 = ref_forward(x2, params)
    assert out2.shape == (B2, out_dim)
    np.testing.assert_allclose(np.asarray(out2), np.asarray(ref2), rtol=3e-2, atol=3e-2)

    print("KERNEL_OK")
</pallas_src>

<mosaic_0001>
module attributes {stable_mosaic.version = 11 : i64} {
  func.func @context_encoder_kernel(%arg0: i32, %arg1: memref<2x8x4xf32, #tpu.memory_space<vmem>>, %arg2: memref<3x4x64xbf16, #tpu.memory_space<vmem>>, %arg3: memref<1x64xf32, #tpu.memory_space<vmem>>, %arg4: memref<3x64x32xbf16, #tpu.memory_space<vmem>>, %arg5: memref<1x32xf32, #tpu.memory_space<vmem>>, %arg6: memref<3x32x32xbf16, #tpu.memory_space<vmem>>, %arg7: memref<1x32xf32, #tpu.memory_space<vmem>>, %arg8: memref<2x128xf32, #tpu.memory_space<vmem>>) attributes {dimension_semantics = [#tpu.dimension_semantics<parallel>], iteration_bounds = array<i64: 1>, scalar_prefetch = 0 : i64, scratch_operands = 0 : i64, tpu.core_type = #tpu.core_type<tc>, window_params = [{transform_indices = @transform_0, window_bounds = array<i64: 2, 8, 4>}, {pipeline_mode = #tpu.pipeline_mode<synchronous>, transform_indices = @transform_1, window_bounds = array<i64: 3, 4, 64>}, {pipeline_mode = #tpu.pipeline_mode<synchronous>, transform_indices = @transform_2, window_bounds = array<i64: 1, 64>}, {pipeline_mode = #tpu.pipeline_mode<synchronous>, transform_indices = @transform_3, window_bounds = array<i64: 3, 64, 32>}, {pipeline_mode = #tpu.pipeline_mode<synchronous>, transform_indices = @transform_4, window_bounds = array<i64: 1, 32>}, {pipeline_mode = #tpu.pipeline_mode<synchronous>, transform_indices = @transform_5, window_bounds = array<i64: 3, 32, 32>}, {pipeline_mode = #tpu.pipeline_mode<synchronous>, transform_indices = @transform_6, window_bounds = array<i64: 1, 32>}, {transform_indices = @transform_7, window_bounds = array<i64: 2, 128>}]} {
    %c0 = arith.constant 0 : index
    %c0_0 = arith.constant 0 : index
    %c0_1 = arith.constant 0 : index
    %0 = vector.load %arg1[%c0, %c0_0, %c0_1] : memref<2x8x4xf32, #tpu.memory_space<vmem>>, vector<2x8x4xf32>
    %1 = vector.shape_cast %0 : vector<2x8x4xf32> to vector<16x4xf32>
    %2 = tpu.iota {dimensions = array<i32: 0>} : vector<16x1xi32>
    %c8_i32 = arith.constant 8 : i32
    %c0_i32 = arith.constant 0 : i32
    %3 = arith.cmpi eq, %c8_i32, %c0_i32 : i32
    %c1_i32 = arith.constant 1 : i32
    %4 = arith.select %3, %c1_i32, %c8_i32 : i32
    %5 = vector.broadcast %4 : i32 to vector<16x1xi32>
    %6 = arith.remsi %2, %5 : vector<16x1xi32>
    %c0_i32_2 = arith.constant 0 : i32
    %7 = vector.broadcast %c0_i32_2 : i32 to vector<16x1xi32>
    %8 = arith.cmpi ne, %6, %7 : vector<16x1xi32>
    %c0_i32_3 = arith.constant 0 : i32
    %9 = vector.broadcast %c0_i32_3 : i32 to vector<16x1xi32>
    %10 = arith.cmpi slt, %6, %9 : vector<16x1xi32>
    %c0_i32_4 = arith.constant 0 : i32
    %11 = arith.cmpi slt, %4, %c0_i32_4 : i32
    %12 = vector.broadcast %11 : i1 to vector<16x1xi1>
    %13 = vector.broadcast %12 : vector<16x1xi1> to vector<16x1xi1>
    %14 = arith.xori %10, %13 : vector<16x1xi1>
    %15 = arith.andi %14, %8 : vector<16x1xi1>
    %16 = vector.broadcast %4 : i32 to vector<16x1xi32>
    %17 = arith.addi %6, %16 : vector<16x1xi32>
    %18 = arith.select %15, %17, %6 : vector<16x1xi1>, vector<16x1xi32>
    %c1_i32_5 = arith.constant 1 : i32
    %19 = vector.broadcast %c1_i32_5 : i32 to vector<16x1xi32>
    %20 = arith.cmpi sge, %18, %19 : vector<16x1xi32>
    %c6_i32 = arith.constant 6 : i32
    %21 = vector.broadcast %c6_i32 : i32 to vector<16x1xi32>
    %22 = arith.cmpi sle, %18, %21 : vector<16x1xi32>
    %c0_6 = arith.constant 0 : index
    %c0_7 = arith.constant 0 : index
    %c0_8 = arith.constant 0 : index
    %23 = vector.load %arg2[%c0_6, %c0_7, %c0_8] : memref<3x4x64xbf16, #tpu.memory_space<vmem>>, vector<3x4x64xbf16>
    %c0_9 = arith.constant 0 : index
    %c0_10 = arith.constant 0 : index
    %24 = vector.load %arg3[%c0_9, %c0_10] : memref<1x64xf32, #tpu.memory_space<vmem>>, vector<1x64xf32>
    %25 = arith.truncf %1 : vector<16x4xf32> to vector<16x4xbf16>
    %26 = vector.extract_strided_slice %23 {offsets = [0, 0, 0], sizes = [1, 4, 64], strides = [1, 1, 1]} : vector<3x4x64xbf16> to vector<1x4x64xbf16>
    %27 = vector.shape_cast %26 : vector<1x4x64xbf16> to vector<4x64xbf16>
    %cst = arith.constant dense<0.000000e+00> : vector<16x64xf32>
    %28 = tpu.matmul %25, %27, %cst {dimension_numbers = #tpu.dot_dimension_numbers<[1], [0], [0], [1], [0, 0, 1, 1], [], []>} : vector<16x4xbf16>, vector<4x64xbf16>, vector<16x64xf32> -> vector<16x64xf32>
    %29 = vector.extract_strided_slice %23 {offsets = [1, 0, 0], sizes = [1, 4, 64], strides = [1, 1, 1]} : vector<3x4x64xbf16> to vector<1x4x64xbf16>
    %30 = vector.shape_cast %29 : vector<1x4x64xbf16> to vector<4x64xbf16>
    %cst_11 = arith.constant dense<0.000000e+00> : vector<16x64xf32>
    %31 = tpu.matmul %25, %30, %cst_11 {dimension_numbers = #tpu.dot_dimension_numbers<[1], [0], [0], [1], [0, 0, 1, 1], [], []>} : vector<16x4xbf16>, vector<4x64xbf16>, vector<16x64xf32> -> vector<16x64xf32>
    %32 = vector.extract_strided_slice %23 {offsets = [2, 0, 0], sizes = [1, 4, 64], strides = [1, 1, 1]} : vector<3x4x64xbf16> to vector<1x4x64xbf16>
    %33 = vector.shape_cast %32 : vector<1x4x64xbf16> to vector<4x64xbf16>
    %cst_12 = arith.constant dense<0.000000e+00> : vector<16x64xf32>
    %34 = tpu.matmul %25, %33, %cst_12 {dimension_numbers = #tpu.dot_dimension_numbers<[1], [0], [0], [1], [0, 0, 1, 1], [], []>} : vector<16x4xbf16>, vector<4x64xbf16>, vector<16x64xf32> -> vector<16x64xf32>
    %35 = vector.extract_strided_slice %28 {offsets = [15, 0], sizes = [1, 64], strides = [1, 1]} : vector<16x64xf32> to vector<1x64xf32>
    %36 = vector.extract_strided_slice %28 {offsets = [0, 0], sizes = [15, 64], strides = [1, 1]} : vector<16x64xf32> to vector<15x64xf32>
    %37 = tpu.concatenate %35, %36 in 0 : vector<1x64xf32>, vector<15x64xf32> -> vector<16x64xf32>
    %cst_13 = arith.constant 0.000000e+00 : f32
    %38 = vector.shape_cast %20 : vector<16x1xi1> to vector<16x1xi1>
    %39 = vector.broadcast %38 : vector<16x1xi1> to vector<16x64xi1>
    %40 = vector.broadcast %cst_13 : f32 to vector<16x64xf32>
    %41 = arith.select %39, %37, %40 : vector<16x64xi1>, vector<16x64xf32>
    %42 = vector.extract_strided_slice %34 {offsets = [1, 0], sizes = [15, 64], strides = [1, 1]} : vector<16x64xf32> to vector<15x64xf32>
    %43 = vector.extract_strided_slice %34 {offsets = [0, 0], sizes = [1, 64], strides = [1, 1]} : vector<16x64xf32> to vector<1x64xf32>
    %44 = tpu.concatenate %42, %43 in 0 : vector<15x64xf32>, vector<1x64xf32> -> vector<16x64xf32>
    %cst_14 = arith.constant 0.000000e+00 : f32
    %45 = vector.shape_cast %22 : vector<16x1xi1> to vector<16x1xi1>
    %46 = vector.broadcast %45 : vector<16x1xi1> to vector<16x64xi1>
    %47 = vector.broadcast %cst_14 : f32 to vector<16x64xf32>
    %48 = arith.select %46, %44, %47 : vector<16x64xi1>, vector<16x64xf32>
    %49 = arith.addf %41, %31 : vector<16x64xf32>
    %50 = arith.addf %49, %48 : vector<16x64xf32>
    %51 = vector.broadcast %24 : vector<1x64xf32> to vector<16x64xf32>
    %52 = arith.addf %50, %51 : vector<16x64xf32>
    %cst_15 = arith.constant 0.000000e+00 : f32
    %53 = vector.broadcast %cst_15 : f32 to vector<16x64xf32>
    %54 = arith.maximumf %52, %53 : vector<16x64xf32>
    %c0_16 = arith.constant 0 : index
    %c0_17 = arith.constant 0 : index
    %c0_18 = arith.constant 0 : index
    %55 = vector.load %arg4[%c0_16, %c0_17, %c0_18] : memref<3x64x32xbf16, #tpu.memory_space<vmem>>, vector<3x64x32xbf16>
    %c0_19 = arith.constant 0 : index
    %c0_20 = arith.constant 0 : index
    %56 = vector.load %arg5[%c0_19, %c0_20] : memref<1x32xf32, #tpu.memory_space<vmem>>, vector<1x32xf32>
    %57 = arith.truncf %54 : vector<16x64xf32> to vector<16x64xbf16>
    %58 = vector.extract_strided_slice %55 {offsets = [0, 0, 0], sizes = [1, 64, 32], strides = [1, 1, 1]} : vector<3x64x32xbf16> to vector<1x64x32xbf16>
    %59 = vector.shape_cast %58 : vector<1x64x32xbf16> to vector<64x32xbf16>
    %cst_21 = arith.constant dense<0.000000e+00> : vector<16x32xf32>
    %60 = tpu.matmul %57, %59, %cst_21 {dimension_numbers = #tpu.dot_dimension_numbers<[1], [0], [0], [1], [0, 0, 1, 1], [], []>} : vector<16x64xbf16>, vector<64x32xbf16>, vector<16x32xf32> -> vector<16x32xf32>
    %61 = vector.extract_strided_slice %55 {offsets = [1, 0, 0], sizes = [1, 64, 32], strides = [1, 1, 1]} : vector<3x64x32xbf16> to vector<1x64x32xbf16>
    %62 = vector.shape_cast %61 : vector<1x64x32xbf16> to vector<64x32xbf16>
    %cst_22 = arith.constant dense<0.000000e+00> : vector<16x32xf32>
    %63 = tpu.matmul %57, %62, %cst_22 {dimension_numbers = #tpu.dot_dimension_numbers<[1], [0], [0], [1], [0, 0, 1, 1], [], []>} : vector<16x64xbf16>, vector<64x32xbf16>, vector<16x32xf32> -> vector<16x32xf32>
    %64 = vector.extract_strided_slice %55 {offsets = [2, 0, 0], sizes = [1, 64, 32], strides = [1, 1, 1]} : vector<3x64x32xbf16> to vector<1x64x32xbf16>
    %65 = vector.shape_cast %64 : vector<1x64x32xbf16> to vector<64x32xbf16>
    %cst_23 = arith.constant dense<0.000000e+00> : vector<16x32xf32>
    %66 = tpu.matmul %57, %65, %cst_23 {dimension_numbers = #tpu.dot_dimension_numbers<[1], [0], [0], [1], [0, 0, 1, 1], [], []>} : vector<16x64xbf16>, vector<64x32xbf16>, vector<16x32xf32> -> vector<16x32xf32>
    %67 = vector.extract_strided_slice %60 {offsets = [15, 0], sizes = [1, 32], strides = [1, 1]} : vector<16x32xf32> to vector<1x32xf32>
    %68 = vector.extract_strided_slice %60 {offsets = [0, 0], sizes = [15, 32], strides = [1, 1]} : vector<16x32xf32> to vector<15x32xf32>
    %69 = tpu.concatenate %67, %68 in 0 : vector<1x32xf32>, vector<15x32xf32> -> vector<16x32xf32>
    %cst_24 = arith.constant 0.000000e+00 : f32
    %70 = vector.shape_cast %20 : vector<16x1xi1> to vector<16x1xi1>
    %71 = vector.broadcast %70 : vector<16x1xi1> to vector<16x32xi1>
    %72 = vector.broadcast %cst_24 : f32 to vector<16x32xf32>
    %73 = arith.select %71, %69, %72 : vector<16x32xi1>, vector<16x32xf32>
    %74 = vector.extract_strided_slice %66 {offsets = [1, 0], sizes = [15, 32], strides = [1, 1]} : vector<16x32xf32> to vector<15x32xf32>
    %75 = vector.extract_strided_slice %66 {offsets = [0, 0], sizes = [1, 32], strides = [1, 1]} : vector<16x32xf32> to vector<1x32xf32>
    %76 = tpu.concatenate %74, %75 in 0 : vector<15x32xf32>, vector<1x32xf32> -> vector<16x32xf32>
    %cst_25 = arith.constant 0.000000e+00 : f32
    %77 = vector.shape_cast %22 : vector<16x1xi1> to vector<16x1xi1>
    %78 = vector.broadcast %77 : vector<16x1xi1> to vector<16x32xi1>
    %79 = vector.broadcast %cst_25 : f32 to vector<16x32xf32>
    %80 = arith.select %78, %76, %79 : vector<16x32xi1>, vector<16x32xf32>
    %81 = arith.addf %73, %63 : vector<16x32xf32>
    %82 = arith.addf %81, %80 : vector<16x32xf32>
    %83 = vector.broadcast %56 : vector<1x32xf32> to vector<16x32xf32>
    %84 = arith.addf %82, %83 : vector<16x32xf32>
    %cst_26 = arith.constant 0.000000e+00 : f32
    %85 = vector.broadcast %cst_26 : f32 to vector<16x32xf32>
    %86 = arith.maximumf %84, %85 : vector<16x32xf32>
    %c0_27 = arith.constant 0 : index
    %c0_28 = arith.constant 0 : index
    %c0_29 = arith.constant 0 : index
    %87 = vector.load %arg6[%c0_27, %c0_28, %c0_29] : memref<3x32x32xbf16, #tpu.memory_space<vmem>>, vector<3x32x32xbf16>
    %c0_30 = arith.constant 0 : index
    %c0_31 = arith.constant 0 : index
    %88 = vector.load %arg7[%c0_30, %c0_31] : memref<1x32xf32, #tpu.memory_space<vmem>>, vector<1x32xf32>
    %89 = arith.truncf %86 : vector<16x32xf32> to vector<16x32xbf16>
    %90 = vector.extract_strided_slice %87 {offsets = [0, 0, 0], sizes = [1, 32, 32], strides = [1, 1, 1]} : vector<3x32x32xbf16> to vector<1x32x32xbf16>
    %91 = vector.shape_cast %90 : vector<1x32x32xbf16> to vector<32x32xbf16>
    %cst_32 = arith.constant dense<0.000000e+00> : vector<16x32xf32>
    %92 = tpu.matmul %89, %91, %cst_32 {dimension_numbers = #tpu.dot_dimension_numbers<[1], [0], [0], [1], [0, 0, 1, 1], [], []>} : vector<16x32xbf16>, vector<32x32xbf16>, vector<16x32xf32> -> vector<16x32xf32>
    %93 = vector.extract_strided_slice %87 {offsets = [1, 0, 0], sizes = [1, 32, 32], strides = [1, 1, 1]} : vector<3x32x32xbf16> to vector<1x32x32xbf16>
    %94 = vector.shape_cast %93 : vector<1x32x32xbf16> to vector<32x32xbf16>
    %cst_33 = arith.constant dense<0.000000e+00> : vector<16x32xf32>
    %95 = tpu.matmul %89, %94, %cst_33 {dimension_numbers = #tpu.dot_dimension_numbers<[1], [0], [0], [1], [0, 0, 1, 1], [], []>} : vector<16x32xbf16>, vector<32x32xbf16>, vector<16x32xf32> -> vector<16x32xf32>
    %96 = vector.extract_strided_slice %87 {offsets = [2, 0, 0], sizes = [1, 32, 32], strides = [1, 1, 1]} : vector<3x32x32xbf16> to vector<1x32x32xbf16>
    %97 = vector.shape_cast %96 : vector<1x32x32xbf16> to vector<32x32xbf16>
    %cst_34 = arith.constant dense<0.000000e+00> : vector<16x32xf32>
    %98 = tpu.matmul %89, %97, %cst_34 {dimension_numbers = #tpu.dot_dimension_numbers<[1], [0], [0], [1], [0, 0, 1, 1], [], []>} : vector<16x32xbf16>, vector<32x32xbf16>, vector<16x32xf32> -> vector<16x32xf32>
    %99 = vector.extract_strided_slice %92 {offsets = [15, 0], sizes = [1, 32], strides = [1, 1]} : vector<16x32xf32> to vector<1x32xf32>
    %100 = vector.extract_strided_slice %92 {offsets = [0, 0], sizes = [15, 32], strides = [1, 1]} : vector<16x32xf32> to vector<15x32xf32>
    %101 = tpu.concatenate %99, %100 in 0 : vector<1x32xf32>, vector<15x32xf32> -> vector<16x32xf32>
    %cst_35 = arith.constant 0.000000e+00 : f32
    %102 = vector.shape_cast %20 : vector<16x1xi1> to vector<16x1xi1>
    %103 = vector.broadcast %102 : vector<16x1xi1> to vector<16x32xi1>
    %104 = vector.broadcast %cst_35 : f32 to vector<16x32xf32>
    %105 = arith.select %103, %101, %104 : vector<16x32xi1>, vector<16x32xf32>
    %106 = vector.extract_strided_slice %98 {offsets = [1, 0], sizes = [15, 32], strides = [1, 1]} : vector<16x32xf32> to vector<15x32xf32>
    %107 = vector.extract_strided_slice %98 {offsets = [0, 0], sizes = [1, 32], strides = [1, 1]} : vector<16x32xf32> to vector<1x32xf32>
    %108 = tpu.concatenate %106, %107 in 0 : vector<15x32xf32>, vector<1x32xf32> -> vector<16x32xf32>
    %cst_36 = arith.constant 0.000000e+00 : f32
    %109 = vector.shape_cast %22 : vector<16x1xi1> to vector<16x1xi1>
    %110 = vector.broadcast %109 : vector<16x1xi1> to vector<16x32xi1>
    %111 = vector.broadcast %cst_36 : f32 to vector<16x32xf32>
    %112 = arith.select %110, %108, %111 : vector<16x32xi1>, vector<16x32xf32>
    %113 = arith.addf %105, %95 : vector<16x32xf32>
    %114 = arith.addf %113, %112 : vector<16x32xf32>
    %115 = vector.broadcast %88 : vector<1x32xf32> to vector<16x32xf32>
    %116 = arith.addf %114, %115 : vector<16x32xf32>
    %cst_37 = arith.constant 0.000000e+00 : f32
    %117 = vector.broadcast %cst_37 : f32 to vector<16x32xf32>
    %118 = arith.maximumf %116, %117 : vector<16x32xf32>
    %119 = vector.shape_cast %54 : vector<16x64xf32> to vector<2x8x64xf32>
    %cst_38 = arith.constant dense<0xFF800000> : vector<2x64xf32>
    %120 = vector.multi_reduction <maximumf>, %119, %cst_38 [1] : vector<2x8x64xf32> to vector<2x64xf32>
    %121 = vector.shape_cast %86 : vector<16x32xf32> to vector<2x8x32xf32>
    %cst_39 = arith.constant dense<0xFF800000> : vector<2x32xf32>
    %122 = vector.multi_reduction <maximumf>, %121, %cst_39 [1] : vector<2x8x32xf32> to vector<2x32xf32>
    %123 = vector.shape_cast %118 : vector<16x32xf32> to vector<2x8x32xf32>
    %cst_40 = arith.constant dense<0xFF800000> : vector<2x32xf32>
    %124 = vector.multi_reduction <maximumf>, %123, %cst_40 [1] : vector<2x8x32xf32> to vector<2x32xf32>
    %125 = tpu.concatenate %120, %122, %124 in 1 : vector<2x64xf32>, vector<2x32xf32>, vector<2x32xf32> -> vector<2x128xf32>
    %c0_41 = arith.constant 0 : index
    %c0_42 = arith.constant 0 : index
    %126 = vector.load %arg8[%c0_41, %c0_42] : memref<2x128xf32, #tpu.memory_space<vmem>>, vector<2x128xf32>
    tpu.vector_store %arg8[%c0_41, %c0_42], %125 {strides = array<i32>} : memref<2x128xf32, #tpu.memory_space<vmem>>, vector<2x128xf32>,
    return
  }
  func.func @transform_0(%arg0: i32) -> (i32, i32, i32) {
    %c0_i32 = arith.constant 0 : i32
    %c0_i32_0 = arith.constant 0 : i32
    %c0_i32_1 = arith.constant 0 : i32
    return %arg0, %c0_i32, %c0_i32_0 : i32, i32, i32
  }
  func.func @transform_1(%arg0: i32) -> (i32, i32, i32) {
    %c0_i32 = arith.constant 0 : i32
    %c0_i32_0 = arith.constant 0 : i32
    %c0_i32_1 = arith.constant 0 : i32
    %c0_i32_2 = arith.constant 0 : i32
    return %c0_i32, %c0_i32_0, %c0_i32_1 : i32, i32, i32
  }
  func.func @transform_2(%arg0: i32) -> (i32, i32) {
    %c0_i32 = arith.constant 0 : i32
    %c0_i32_0 = arith.constant 0 : i32
    %c0_i32_1 = arith.constant 0 : i32
    return %c0_i32, %c0_i32_0 : i32, i32
  }
  func.func @transform_3(%arg0: i32) -> (i32, i32, i32) {
    %c0_i32 = arith.constant 0 : i32
    %c0_i32_0 = arith.constant 0 : i32
    %c0_i32_1 = arith.constant 0 : i32
    %c0_i32_2 = arith.constant 0 : i32
    return %c0_i32, %c0_i32_0, %c0_i32_1 : i32, i32, i32
  }
  func.func @transform_4(%arg0: i32) -> (i32, i32) {
    %c0_i32 = arith.constant 0 : i32
    %c0_i32_0 = arith.constant 0 : i32
    %c0_i32_1 = arith.constant 0 : i32
    return %c0_i32, %c0_i32_0 : i32, i32
  }
  func.func @transform_5(%arg0: i32) -> (i32, i32, i32) {
    %c0_i32 = arith.constant 0 : i32
    %c0_i32_0 = arith.constant 0 : i32
    %c0_i32_1 = arith.constant 0 : i32
    %c0_i32_2 = arith.constant 0 : i32
    return %c0_i32, %c0_i32_0, %c0_i32_1 : i32, i32, i32
  }
  func.func @transform_6(%arg0: i32) -> (i32, i32) {
    %c0_i32 = arith.constant 0 : i32
    %c0_i32_0 = arith.constant 0 : i32
    %c0_i32_1 = arith.constant 0 : i32
    return %c0_i32, %c0_i32_0 : i32, i32
  }
  func.func @transform_7(%arg0: i32) -> (i32, i32) {
    %c0_i32 = arith.constant 0 : i32
    %c0_i32_0 = arith.constant 0 : i32
    return %arg0, %c0_i32 : i32, i32
  }
}

</mosaic_0001>

<bundles_post_ra>
// kernel: tpu_custom_call.1
= control target key start
LH: loop header
LB: loop body
LE: loop exit
PB: predicated region body
PF: predicated region fallthrough
CT: control target
= control target key end

     0   :  { %vm70_vm0 = vcmask 1041408   ;;  %v985_v2 = vmov 0.0   ;;  %vm986_vm1 = vmmov 0   ;;  %vm66_vm2 = vcmask 31744   ;;  %s1233_s0 = inlined_call_operand.vmem [shape: f32[2,8,4], index: 0, kind: input, shape index: {}]   ;;  %s1234_s1 = inlined_call_operand.vmem [shape: bf16[3,4,64], index: 1, kind: input, shape index: {}]   ;;  %s1235_s2 = inlined_call_operand.vmem [shape: f32[1,64], index: 2, kind: input, shape index: {}]   ;;  %s1236_s3 = inlined_call_operand.vmem [shape: bf16[3,64,32], index: 3, kind: input, shape index: {}]   ;;  %s1237_s4 = inlined_call_operand.vmem [shape: f32[1,32], index: 4, kind: input, shape index: {}]   ;;  %s1238_s5 = inlined_call_operand.vmem [shape: bf16[3,32,32], index: 5, kind: input, shape index: {}]   ;;  %s1239_s6 = inlined_call_operand.vmem [shape: f32[1,32], index: 6, kind: input, shape index: {}]   ;;  %s1240_s7 = inlined_call_operand.hbm [shape: f32[2,128], index: 7, kind: output, shape index: {}]  }
   0x1   :  { %v61_v0 = vld [vmem:[%s1234_s1] sm:$0x3]  ;;  %860 = vmatprep.subr.bf16.mxu0 %v985_v2  ;;  %862 = vmatprep.mubr.msk.bf16.mxu0 %vm986_vm1, %v985_v2  ;;  %v29_v4 = vld [vmem:[%s1233_s0 + $0x8] sm:$0xff]  ;;  %v62_v5 = vld [vmem:[%s1234_s1 + $0x2] sm:$0x3] }
   0x2   :  { %v28_v1 = vld [vmem:[%s1233_s0] sm:$0xff]  ;;  %v72_v3 = vsel %vm70_vm0, %v61_v0, 0  ;;  %866 = vmatprep.subr.bf16.mxu1 %v985_v2  ;;  %v116_v7 = vsel %vm70_vm0, %v62_v5, 0  ;;  %868 = vmatprep.mubr.msk.bf16.mxu1 %vm986_vm1, %v985_v2 }
   0x3   :  { %861 = vmatpush3.bf16.msra.mxu0 %v72_v3  ;;  %v65_v6 = vpack.c.bf16 %v29_v4, %v28_v1  ;;  %v63_v8 = vld [vmem:[%s1234_s1 + $0x4] sm:$0x3]  ;;  %867 = vmatpush3.bf16.msra.mxu1 %v116_v7 }
   0x4   :  { %872 = vmatprep.subr.bf16.mxu0 %v985_v2  ;;  %v160_v9 = vsel %vm70_vm0, %v63_v8, 0  ;;  %878 = vmatprep.subr.bf16.mxu1 %v985_v2 }
   0x6   :  { %863 = vmatmul.mubr.msk.bf16.vlgmr.msra.gmra.mrb[0].mxu0 %vm66_vm2, %v65_v6  ;;  %869 = vmatmul.mubr.msk.bf16.vlgmr.msra.gmra.mrb[0].mxu1 %vm66_vm2, %v65_v6 }
   0x7   :  { %873 = vmatpush3.bf16.msra.mxu0 %v160_v9  ;;  %874 = vmatprep.mubr.msk.bf16.mxu0 %vm986_vm1, %v985_v2 }
   0x8   :  { %890 = vmatprep.subr.bf16.mxu0 %v985_v2  ;;  %886 = vmatprep.mubr.msk.bf16.mxu1 %vm986_vm1, %v985_v2 }
   0xe   :  { %875 = vmatmul.mubr.msk.bf16.vlgmr.msra.gmra.mrb[4].mxu0 %vm66_vm2, %v65_v6 }
   0xf   :  { %898 = vmatprep.mubr.msk.bf16.mxu0 %vm986_vm1, %v985_v2 }
  0x10   :  { %12 = vsyncpa [#allocation3], 0  ;;  %v943_v10 = vld [vmem:[%s1236_s3] sm:$0xff]   ;;  %v945_v12 = vld [vmem:[%s1236_s3 + $0x8] sm:$0xff]   ;;  %v30_v18 = vlaneseq  ;;  %vm207_vm3 = vcmask 1040384   ;;  %vm221_vm6 = vcmask 1046528  }
  0x11   :  { %v944_v11 = vld [vmem:[%s1236_s3 + $0x20] sm:$0xff]   ;;  %879 = vmatpush3.bf16.msra.mxu1 %v943_v10  ;;  %v946_v13 = vld [vmem:[%s1236_s3 + $0x28] sm:$0xff]   ;;  %v947_v14 = vld [vmem:[%s1236_s3 + $0x10] sm:$0xff]   ;;  %vm299_vm9 = vcmask 523264   ;;  %vm767_vm10 = vcmask 1041409   ;;  %vm536_vm11 = vcmask 261120  }
  0x12   :  { %891 = vmatpush3.bf16.msra.mxu0 %v944_v11  ;;  %880 = vmatprep.subr.bf16.mxu1 %v985_v2  ;;  %v948_v15 = vld [vmem:[%s1236_s3 + $0x30] sm:$0xff]   ;;  %v949_v16 = vld [vmem:[%s1236_s3 + $0x18] sm:$0xff]   ;;  %v31_v19 = vshrl.u32 %v30_v18, 7  ;;  %v803_v51 = vld [vmem:[%s1235_s2] ss:$0 sm:$0xff]  ;;  %s989_s23 = smov [#allocation2]  }
  0x13   :  { %892 = vmatprep.subr.bf16.mxu0 %v985_v2  ;;  %v950_v17 = vld [vmem:[%s1236_s3 + $0x38] sm:$0xff]   ;;  %v951_v60 = vld [vmem:[%s1236_s3 + $0x40] sm:$0xff]   ;;  %v952_v3 = vld [vmem:[%s1236_s3 + $0x48] sm:$0xff]   ;;  %s792_s24 = sshll.u32 %s989_s23, 4  ;;  %vm783_vm12 = vcmask 785408   ;;  %s793_s24 = int_to_ptr.vmem [resolvable:$true] %s792_s24 }
  0x14   :  { %v32_v20 = vadd.s32 8, %v31_v19  ;;  %v37_v21 = vand.u32 7, %v31_v19  ;;  %v953_v8 = vld [vmem:[%s1236_s3 + $0x50] sm:$0xff]   ;;  %v956_v18 = vld [vmem:[%s1238_s5 + $0x20] sm:$0xff]   ;;  %v957_v19 = vld [vmem:[%s1238_s5 + $0x8] sm:$0xff]   ;;  %s961_s25 = scalar_lea.vmem %s793_s24, 32  ;;  %p966_p1 = scmp.lt.s32.totalorder %s793_s24, %s793_s24 }
  0x15   :  { %881 = vmatpush3.bf16.msra.mxu1 %v945_v12  ;;  %p962_p0 = scmp.ne.s32.totalorder %s793_s24, %s961_s25  ;;  %p967_p2 = scmp.lt.s32.totalorder %s961_s25, %s961_s25 }
  0x16   :  { %893 = vmatpush3.bf16.msra.mxu0 %v946_v13  ;;  %882 = vmatprep.subr.bf16.mxu1 %v985_v2  ;;  %v44_v22 = vand.u32 7, %v32_v20  ;;  %vm1095_vm4 = vcmp.ge.s32.totalorder %v37_v21, 1  ;;  %vm1109_vm7 = vcmp.le.s32.totalorder %v37_v21, 6  ;;  %v954_v13 = vld [vmem:[%s1236_s3 + $0x58] sm:$0xff]   ;;  %v958_v20 = vld [vmem:[%s1238_s5 + $0x28] sm:$0xff]  }
  0x17   :  { %894 = vmatprep.subr.bf16.mxu0 %v985_v2  ;;  %p968_p3 = por %p967_p2, %p966_p1 }
  0x18   :  { %vm1099_vm5 = vcmp.ge.s32.totalorder %v44_v22, 1  ;;  %vm1113_vm8 = vcmp.le.s32.totalorder %v44_v22, 6 }
  0x19   :  { %883 = vmatpush3.bf16.msra.mxu1 %v947_v14  ;;  %p969_p4 = pnand %p968_p3, %p962_p0 }
  0x1a   :  { %895 = vmatpush3.bf16.msra.mxu0 %v948_v15  ;;  %884 = vmatprep.subr.bf16.mxu1 %v985_v2 }
  0x1b   :  { %896 = vmatprep.subr.bf16.mxu0 %v985_v2 }
  0x1d   :  { %885 = vmatpush3.bf16.msra.mxu1 %v949_v16 }
  0x1e   :  { %897 = vmatpush3.bf16.msra.mxu0 %v950_v17  ;;  %902 = vmatprep.subr.bf16.mxu1 %v985_v2  ;;  %v955_v17 = vld [vmem:[%s1238_s5] sm:$0xff]  }
  0x1f   :  { %914 = vmatprep.subr.bf16.mxu0 %v985_v2 }
  0xd9   :  { %v108_v23 = vpop.f32.mrb[0].mxu0  ;;  %v152_v25 = vpop.f32.mrb[0].mxu1 }
  0xda   :  { %v864_v24 = vpop.f32.mrb[1].mxu0  ;;  %v870_v27 = vpop.f32.mrb[1].mxu1  ;;  %v208_v28 = vrot.slane %v108_v23, 7 }
  0xdb   :  { %v111_v26 = vpop.f32.mrb[2].mxu0  ;;  %v155_v33 = vpop.f32.mrb[2].mxu1 }
  0xdc   :  { %v204_v29 = vrot.slane %v111_v26, 7  ;;  %v865_v30 = vpop.f32.mrb[3].mxu0  ;;  %v871_v34 = vpop.f32.mrb[3].mxu1 }
  0xde   :  { %v212_v35 = vsel %vm207_vm3, %v204_v29, %v208_v28  ;;  %v209_v36 = vsel %vm207_vm3, %v208_v28, %v204_v29 }
  0xdf   :  { %v217_v37 = vsel %vm1095_vm4, %v212_v35, 0.0  ;;  %v218_v38 = vsel %vm1099_vm5, %v209_v36, 0.0 }
  0xe0   :  { %v235_v39 = vadd.f32 %v217_v37, %v152_v25  ;;  %v236_v40 = vadd.f32 %v218_v38, %v155_v33 }
  0xe1   :  { %v196_v41 = vpop.f32.mrb[4].mxu0 }
  0xe2   :  { %v876_v42 = vpop.f32.mrb[5].mxu0  ;;  %v222_v46 = vrot.slane %v196_v41, 1 }
  0xe3   :  { %v199_v43 = vpop.f32.mrb[6].mxu0 }
  0xe4   :  { %v223_v47 = vrot.slane %v199_v43, 1  ;;  %v877_v48 = vpop.f32.mrb[7].mxu0 }
  0xe6   :  { %v224_v49 = vsel %vm221_vm6, %v222_v46, %v223_v47  ;;  %v228_v50 = vsel %vm221_vm6, %v223_v47, %v222_v46 }
  0xe7   :  { %v233_v52 = vsel %vm1109_vm7, %v224_v49, 0.0  ;;  %v234_v53 = vsel %vm1113_vm8, %v228_v50, 0.0  ;;  %v819_v49 = vld [vmem:[%s1237_s4] ss:$0 sm:$0xff] }
  0xe8   :  { %v237_v54 = vadd.f32 %v235_v39, %v233_v52  ;;  %v238_v55 = vadd.f32 %v236_v40, %v234_v53 }
  0xea   :  { %v245_v56 = vadd.f32 %v803_v51, %v237_v54  ;;  %v246_v57 = vadd.f32 %v803_v51, %v238_v55 }
  0xec   :  { %v247_v58 = vmax.f32 %v245_v56, 0.0  ;;  %v248_v59 = vmax.f32 %v246_v57, 0.0 }
  0xee   :  { %v274_v61 = vpack.c.bf16 %v248_v59, %v247_v58  ;;  %v723_v62 = vsel %vm299_vm9, %v247_v58, -inf  ;;  %v730_v63 = vsel %vm299_vm9, %v248_v59, -inf  ;;  %v959_v58 = vld [vmem:[%s1238_s5 + $0x10] sm:$0xff]  }
  0xef   :  { %v724_v0 = vrot.slane %v723_v62, 4  ;;  %v731_v1 = vrot.slane %v730_v63, 4 }
  0xf0   :  { %887 = vmatmul.mubr.msk.bf16.vlgmr.msra.gmra.mrb[4].mxu1 %vm299_vm9, %v274_v61  ;;  %899 = vmatmul.mubr.msk.bf16.vlgmr.msra.gmra.mrb[8].mxu0 %vm299_vm9, %v274_v61 }
  0xf1   :  { %903 = vmatpush3.bf16.msra.mxu1 %v951_v60  ;;  %910 = vmatprep.mubr.msk.bf16.mxu1 %vm986_vm1, %v985_v2  ;;  %v725_v4 = vmax.f32 %v723_v62, %v724_v0  ;;  %v732_v5 = vmax.f32 %v730_v63, %v731_v1  ;;  %v960_v0 = vld [vmem:[%s1238_s5 + $0x18] sm:$0xff]   ;;  %s987_s5 = smov 64  }
  0xf2   :  { %904 = vmatprep.subr.bf16.mxu1 %v985_v2  ;;  %918 = vmatprep.mubr.msk.bf16.mxu0 %vm986_vm1, %v985_v2 }
  0xf3   :  { %v726_v6 = vrot.slane %v725_v4, 2  ;;  %v733_v7 = vrot.slane %v732_v5, 2  ;;  %915 = vmatpush3.bf16.msra.mxu0 %v955_v17 }
  0xf4   :  { %916 = vmatprep.subr.bf16.mxu0 %v985_v2 }
  0xf5   :  { %905 = vmatpush3.bf16.msra.mxu1 %v952_v3  ;;  %v727_v9 = vmax.f32 %v725_v4, %v726_v6  ;;  %v734_v10 = vmax.f32 %v732_v5, %v733_v7 }
  0xf6   :  { %906 = vmatprep.subr.bf16.mxu1 %v985_v2 }
  0xf7   :  { %v728_v11 = vrot.slane %v727_v9, 1  ;;  %v735_v12 = vrot.slane %v734_v10, 1  ;;  %917 = vmatpush3.bf16.msra.mxu0 %v957_v19 }
  0xf8   :  { %922 = vmatprep.subr.bf16.mxu0 %v985_v2 }
  0xf9   :  { %907 = vmatpush3.bf16.msra.mxu1 %v953_v8  ;;  %v729_v14 = vmax.f32 %v727_v9, %v728_v11  ;;  %v736_v15 = vmax.f32 %v734_v10, %v735_v12 }
  0xfa   :  { %908 = vmatprep.subr.bf16.mxu1 %v985_v2 }
  0xfb   :  { %v1150_v16 = vsel %vm767_vm10, %v736_v15, %v729_v14 }
  0xfd   :  { %909 = vmatpush3.bf16.msra.mxu1 %v954_v13 }
  0xfe   :  { %930 = vmatprep.subr.bf16.mxu1 %v985_v2 }
 0x100   :  { %911 = vmatmul.mubr.msk.bf16.vlgmr.msra.gmra.mrb[8].mxu1 %vm299_vm9, %v274_v61 }
 0x101   :  { %934 = vmatprep.mubr.msk.bf16.mxu1 %vm986_vm1, %v985_v2  ;;  %931 = vmatpush3.bf16.msra.mxu1 %v956_v18 }
 0x102   :  { %932 = vmatprep.subr.bf16.mxu1 %v985_v2 }
 0x105   :  { %933 = vmatpush3.bf16.msra.mxu1 %v958_v20 }
 0x1c3   :  { %v337_v21 = vpop.f32.mrb[4].mxu1  ;;  %v402_v22 = vpop.f32.mrb[8].mxu0 }
 0x1c4   :  { %v888_v23 = vpop.f32.mrb[5].mxu1  ;;  %v900_v24 = vpop.f32.mrb[9].mxu0  ;;  %v478_v27 = vrot.slane %v337_v21, 7 }
 0x1c5   :  { %v340_v25 = vpop.f32.mrb[6].mxu1  ;;  %v405_v26 = vpop.f32.mrb[10].mxu0 }
 0x1c6   :  { %v475_v28 = vrot.slane %v340_v25, 7  ;;  %v889_v29 = vpop.f32.mrb[7].mxu1  ;;  %v901_v30 = vpop.f32.mrb[11].mxu0 }
 0x1c8   :  { %v482_v33 = vsel %vm207_vm3, %v475_v28, %v478_v27  ;;  %v479_v34 = vsel %vm207_vm3, %v478_v27, %v475_v28 }
 0x1c9   :  { %v483_v35 = vsel %vm1095_vm4, %v482_v33, 0.0  ;;  %v484_v36 = vsel %vm1099_vm5, %v479_v34, 0.0 }
 0x1ca   :  { %v496_v37 = vadd.f32 %v483_v35, %v402_v22  ;;  %v497_v38 = vadd.f32 %v484_v36, %v405_v26  ;;  %v829_v35 = vld [vmem:[%s1239_s6] ss:$0 sm:$0xff]  ;;  %s988_s6 = smov 96  }
 0x1d3   :  { %v467_v39 = vpop.f32.mrb[8].mxu1 }
 0x1d4   :  { %v912_v40 = vpop.f32.mrb[9].mxu1  ;;  %v487_v42 = vrot.slane %v467_v39, 1 }
 0x1d5   :  { %v470_v41 = vpop.f32.mrb[10].mxu1 }
 0x1d6   :  { %v488_v43 = vrot.slane %v470_v41, 1  ;;  %v913_v46 = vpop.f32.mrb[11].mxu1 }
 0x1d8   :  { %v489_v47 = vsel %vm221_vm6, %v487_v42, %v488_v43  ;;  %v493_v48 = vsel %vm221_vm6, %v488_v43, %v487_v42 }
 0x1d9   :  { %v494_v50 = vsel %vm1109_vm7, %v489_v47, 0.0  ;;  %v495_v51 = vsel %vm1113_vm8, %v493_v48, 0.0 }
 0x1da   :  { %v498_v52 = vadd.f32 %v496_v37, %v494_v50  ;;  %v499_v53 = vadd.f32 %v497_v38, %v495_v51 }
 0x1dc   :  { %v506_v54 = vadd.f32 %v819_v49, %v498_v52  ;;  %v507_v55 = vadd.f32 %v819_v49, %v499_v53 }
 0x1de   :  { %v508_v56 = vmax.f32 %v506_v54, 0.0  ;;  %v509_v57 = vmax.f32 %v507_v55, 0.0 }
 0x1e0   :  { %v523_v59 = vpack.c.bf16 %v509_v57, %v508_v56  ;;  %v737_v60 = vsel %vm536_vm11, %v508_v56, -inf  ;;  %v744_v61 = vsel %vm536_vm11, %v509_v57, -inf }
 0x1e1   :  { %v738_v62 = vrot.slane %v737_v60, 4  ;;  %v745_v63 = vrot.slane %v744_v61, 4 }
 0x1e2   :  { %919 = vmatmul.mubr.msk.bf16.vlgmr.msra.gmra.mrb[12].mxu0 %vm536_vm11, %v523_v59  ;;  %935 = vmatmul.mubr.msk.bf16.vlgmr.msra.gmra.mrb[12].mxu1 %vm536_vm11, %v523_v59 }
 0x1e3   :  { %923 = vmatpush3.bf16.msra.mxu0 %v959_v58  ;;  %926 = vmatprep.mubr.msk.bf16.mxu0 %vm986_vm1, %v985_v2  ;;  %v739_v1 = vmax.f32 %v737_v60, %v738_v62  ;;  %v746_v3 = vmax.f32 %v744_v61, %v745_v63 }
 0x1e4   :  { %924 = vmatprep.subr.bf16.mxu0 %v985_v2 }
 0x1e5   :  { %v740_v4 = vrot.slane %v739_v1, 2  ;;  %v747_v5 = vrot.slane %v746_v3, 2 }
 0x1e7   :  { %925 = vmatpush3.bf16.msra.mxu0 %v960_v0  ;;  %v741_v6 = vmax.f32 %v739_v1, %v740_v4  ;;  %v748_v7 = vmax.f32 %v746_v3, %v747_v5 }
 0x1e9   :  { %v742_v8 = vrot.slane %v741_v6, 1  ;;  %v749_v9 = vrot.slane %v748_v7, 1 }
 0x1ea   :  { %927 = vmatmul.mubr.msk.bf16.vlgmr.msra.gmra.mrb[16].mxu0 %vm536_vm11, %v523_v59 }
 0x1eb   :  { %v743_v10 = vmax.f32 %v741_v6, %v742_v8  ;;  %v750_v11 = vmax.f32 %v748_v7, %v749_v9 }
 0x1ed   :  { %v772_v12 = vsel %vm767_vm10, %v750_v11, %v743_v10 }
 0x1ee   :  { %773 = vrot.lane.b32.xlu0 %v772_v12, %s987_s5 }
 0x260   :  { %v774_v61 = vpop.permute.xlu0 %773 }
 0x261   :  { %v782_v62 = vsel %vm299_vm9, %v1150_v16, %v774_v61 }
 0x2b5   :  { %v574_v13 = vpop.f32.mrb[12].mxu0  ;;  %v680_v14 = vpop.f32.mrb[12].mxu1 }
 0x2b6   :  { %v920_v15 = vpop.f32.mrb[13].mxu0  ;;  %v936_v17 = vpop.f32.mrb[13].mxu1  ;;  %v691_v19 = vrot.slane %v574_v13, 7  ;;  %v700_v20 = vrot.slane %v680_v14, 1 }
 0x2b7   :  { %v577_v2 = vpop.f32.mrb[14].mxu0  ;;  %v683_v18 = vpop.f32.mrb[14].mxu1 }
 0x2b8   :  { %v688_v21 = vrot.slane %v577_v2, 7  ;;  %v701_v22 = vrot.slane %v683_v18, 1  ;;  %v921_v23 = vpop.f32.mrb[15].mxu0  ;;  %v937_v24 = vpop.f32.mrb[15].mxu1 }
 0x2ba   :  { %v695_v25 = vsel %vm207_vm3, %v688_v21, %v691_v19  ;;  %v702_v26 = vsel %vm221_vm6, %v700_v20, %v701_v22  ;;  %v692_v27 = vsel %vm207_vm3, %v691_v19, %v688_v21  ;;  %v706_v28 = vsel %vm221_vm6, %v701_v22, %v700_v20 }
 0x2bb   :  { %v696_v30 = vsel %vm1095_vm4, %v695_v25, 0.0  ;;  %v707_v36 = vsel %vm1109_vm7, %v702_v26, 0.0  ;;  %v697_v38 = vsel %vm1099_vm5, %v692_v27, 0.0  ;;  %v708_v31 = vsel %vm1113_vm8, %v706_v28, 0.0 }
 0x2bd   :  { %v627_v29 = vpop.f32.mrb[16].mxu0 }
 0x2be   :  { %v709_v33 = vadd.f32 %v696_v30, %v627_v29  ;;  %v928_v34 = vpop.f32.mrb[17].mxu0 }
 0x2bf   :  { %v630_v37 = vpop.f32.mrb[18].mxu0 }
 0x2c0   :  { %v711_v39 = vadd.f32 %v709_v33, %v707_v36  ;;  %v710_v40 = vadd.f32 %v697_v38, %v630_v37  ;;  %v929_v41 = vpop.f32.mrb[19].mxu0 }
 0x2c2   :  { %v719_v42 = vadd.f32 %v829_v35, %v711_v39  ;;  %v712_v43 = vadd.f32 %v710_v40, %v708_v31 }
 0x2c4   :  { %v721_v46 = vmax.f32 %v719_v42, 0.0  ;;  %v720_v47 = vadd.f32 %v829_v35, %v712_v43 }
 0x2c6   :  { %v751_v48 = vsel %vm536_vm11, %v721_v46, -inf  ;;  %v722_v49 = vmax.f32 %v720_v47, 0.0 }
 0x2c7   :  { %v752_v50 = vrot.slane %v751_v48, 4 }
 0x2c8   :  { %v758_v44 = vsel %vm536_vm11, %v722_v49, -inf }
 0x2c9   :  { %v753_v51 = vmax.f32 %v751_v48, %v752_v50  ;;  %v759_v52 = vrot.slane %v758_v44, 4 }
 0x2cb   :  { %v754_v32 = vrot.slane %v753_v51, 2  ;;  %v760_v53 = vmax.f32 %v758_v44, %v759_v52 }
 0x2cd   :  { %v761_v54 = vrot.slane %v760_v53, 2  ;;  %v755_v55 = vmax.f32 %v753_v51, %v754_v32 }
 0x2cf   :  { %v756_v56 = vrot.slane %v755_v55, 1  ;;  %v762_v57 = vmax.f32 %v760_v53, %v761_v54 }
 0x2d1   :  { %v763_v45 = vrot.slane %v762_v57, 1  ;;  %v757_v58 = vmax.f32 %v755_v55, %v756_v56 }
 0x2d3   :  { %v764_v59 = vmax.f32 %v762_v57, %v763_v45 }
 0x2d5   :  { %v778_v60 = vsel %vm767_vm10, %v764_v59, %v757_v58 }
 0x2d6   :  { %779 = vrot.lane.b32.xlu0 %v778_v60, %s988_s6 }
 0x348   :  { %v780_v63 = vpop.permute.xlu0 %779 }
 0x349   :  { %v784_v0 = vsel %vm783_vm12, %v782_v62, %v780_v63 }
 0x34a   :  { %785 = vst [vmem:[#allocation2] sm:$0x3] %v784_v0 }
 0x34b   :  { %972 = shalt.err (!%p969_p4)
}
 0x34c   :  { %s973_s28 = scalar_lea.hbm %s1240_s7, 32 }
 0x34d   :  { %p974_p5 = scmp.ne.s32.totalorder %s1240_s7, %s973_s28  ;;  %p977_p6 = scmp.lt.u32.totalorder %s973_s28, %s1240_s7 }
 0x34f   :  { %p979_p7 = pnand %p977_p6, %p974_p5 }
 0x351   :  { %982 = shalt.err (!%p979_p7)
}
 0x352   :  { %795 = dma.vmem_to_hbm [thread:$0]  %s793_s24, 32, %s1240_s7, [#allocation3]  }
 0x353   :  { %983 = dma.done.wait [#allocation3], 32  }
 0x354   :  { %984 = vsyncadd [#allocation3], 4294967264 }
 0x355   :  { %799 = vsyncpa [#allocation3], 1 }

</bundles_post_ra>
